<compile_context>
chip_gen: v5e
topology: v5e:2x2
jax: 0.10.0
libtpu: 0.0.40
codegen_flags: <defaults>
</compile_context>

<pallas_src>
import jax
import jax.numpy as jnp
from jax.experimental import pallas as pl
from jax.experimental.pallas import tpu as pltpu


def _make_conv_relu_kernel(kh, kw, img_w, hw):
    """Kernel factory closing over static conv geometry."""

    def kernel(x_ref, w_ref, o_ref):
        # x_ref: (1, C, H*W) f32   -- one image, channels on sublanes, pixels on lanes
        # w_ref: (KH*KW, Cout, C) bf16, VMEM-resident across the grid
        # o_ref: (1, Cout, H*W) f32
        x_bf = x_ref[0].astype(jnp.bfloat16)                       # (C, H*W), cast on VPU
        cout, _ = w_ref.shape[1], w_ref.shape[2]
        acc = jnp.zeros((cout, hw), jnp.float32)
        for i in range(kh):
            for j in range(kw):
                d = i * img_w + j
                # 1x1-conv style dot for kernel tap (i, j): (Cout, C) @ (C, H*W)
                z = jnp.dot(w_ref[i * kw + j], x_bf,
                            preferred_element_type=jnp.float32)    # (Cout, H*W) f32
                if d:
                    # acc[:, q] needs z[:, q + d]; roll right by hw - d == roll left
                    # by d (XLU lane rotate).  Wrapped lanes only land in the
                    # bottom/right border, which the wrapper crops.
                    z = pltpu.roll(z, hw - d, axis=1)
                acc = acc + z
        # relu(conv(2x, 3w)) * 2 == 12 * relu(conv(x, w))  (exact, 6 > 0)
        o_ref[0] = (jnp.maximum(acc, 0.0) * 12.0).astype(o_ref.dtype)

    return kernel


def wrapper_module_forward(x, weight):
    """Pallas implementation of WrapperModule(fn).forward(x, weight)."""
    n, cin, h, w = x.shape
    cout, cin_w, kh, kw = weight.shape
    assert cin == cin_w
    oh, ow = h - kh + 1, w - kw + 1
    hw = h * w

    # Free (contiguous) reshape: pixels become the lane dimension.
    x_flat = x.reshape(n, cin, hw)
    # (Cout, C, KH, KW) -> (KH*KW, Cout, C), bf16 for the MXU.  Tiny, one-time.
    w_k = jnp.transpose(weight, (2, 3, 0, 1)).reshape(kh * kw, cout, cin)
    w_k = w_k.astype(jnp.bfloat16)

    kernel = _make_conv_relu_kernel(kh, kw, w, hw)

    out_flat = pl.pallas_call(
        kernel,
        out_shape=jax.ShapeDtypeStruct((n, cout, hw), x.dtype),
        grid=(n,),
        in_specs=[
            # One image per grid step, streamed (auto double-buffered).
            pl.BlockSpec((1, cin, hw), lambda b: (b, 0, 0)),
            # Weight: constant block index -> fetched once, VMEM-resident.
            pl.BlockSpec((kh * kw, cout, cin), lambda b: (0, 0, 0)),
        ],
        out_specs=pl.BlockSpec((1, cout, hw), lambda b: (b, 0, 0)),
        compiler_params=pltpu.CompilerParams(
            dimension_semantics=("parallel",),   # images are independent -> v7x 2 TCs
        ),
    )(x_flat, w_k)

    # Free reshape back to spatial, then crop the (KH-1, KW-1) bottom/right
    # border that holds out-of-window garbage.  No transpose needed: the
    # kernel already writes NCHW-ordered data.
    return out_flat.reshape(n, cout, h, w)[:, :, :oh, :ow]


def _reference_f32(x, weight):
    """Exact f32 semantics of the wrapped module."""
    y = jax.lax.conv_general_dilated(
        x * 2.0, weight * 3.0, window_strides=(1, 1), padding="VALID",
        dimension_numbers=("NCHW", "OIHW", "NCHW"),
        precision=jax.lax.Precision.HIGHEST)
    return jnp.maximum(y, 0.0) * 2.0


def _reference_bf16_quantized(x, weight):
    """Reference with the same bf16 input quantization / f32 accumulation as the kernel."""
    xq = x.astype(jnp.bfloat16).astype(jnp.float32)
    wq = weight.astype(jnp.bfloat16).astype(jnp.float32)
    y = jax.lax.conv_general_dilated(
        xq, wq, window_strides=(1, 1), padding="VALID",
        dimension_numbers=("NCHW", "OIHW", "NCHW"),
        precision=jax.lax.Precision.HIGHEST)
    return jnp.maximum(y, 0.0) * 12.0


if __name__ == "__main__":
    key = jax.random.PRNGKey(0)
    kx, kwt = jax.random.split(key)

    # Small shapes consistent with the wrapped conv2d forward.
    x = jax.random.normal(kx, (2, 4, 16, 16), dtype=jnp.float32)       # NCHW
    weight = jax.random.normal(kwt, (8, 4, 3, 3), dtype=jnp.float32)   # OIHW

    out = wrapper_module_forward(x, weight)
    out = jax.block_until_ready(out)

    ref = _reference_f32(x, weight)
    ref_q = _reference_bf16_quantized(x, weight)

    assert out.shape == (2, 8, 14, 14), out.shape
    # Tight structural check against a reference using the same bf16 input
    # quantization (only accumulation order differs).
    assert jnp.allclose(out, ref_q, atol=1e-2, rtol=1e-3), "mismatch vs bf16-quantized reference"
    # Scale-aware fidelity check against the exact f32 module semantics
    # (bf16 MXU inputs give ~0.4% relative input rounding).
    max_err = float(jnp.max(jnp.abs(out - ref)))
    assert max_err < 0.03 * float(jnp.max(jnp.abs(ref))), f"bf16 error too large: {max_err}"

    print("KERNEL_OK")
</pallas_src>

<mosaic_0001>
module attributes {stable_mosaic.version = 11 : i64} {
  func.func @kernel(%arg0: i32, %arg1: memref<1x4x256xf32, #tpu.memory_space<vmem>>, %arg2: memref<9x8x4xbf16, #tpu.memory_space<vmem>>, %arg3: memref<1x8x256xf32, #tpu.memory_space<vmem>>) attributes {dimension_semantics = [#tpu.dimension_semantics<parallel>], iteration_bounds = array<i64: 2>, scalar_prefetch = 0 : i64, scratch_operands = 0 : i64, tpu.core_type = #tpu.core_type<tc>, window_params = [{transform_indices = @transform_0, window_bounds = array<i64: 1, 4, 256>}, {pipeline_mode = #tpu.pipeline_mode<synchronous>, transform_indices = @transform_1, window_bounds = array<i64: 9, 8, 4>}, {transform_indices = @transform_2, window_bounds = array<i64: 1, 8, 256>}]} {
    %c0 = arith.constant 0 : index
    %c0_0 = arith.constant 0 : index
    %c0_1 = arith.constant 0 : index
    %0 = vector.load %arg1[%c0, %c0_0, %c0_1] : memref<1x4x256xf32, #tpu.memory_space<vmem>>, vector<1x4x256xf32>
    %1 = vector.shape_cast %0 : vector<1x4x256xf32> to vector<4x256xf32>
    %2 = arith.truncf %1 : vector<4x256xf32> to vector<4x256xbf16>
    %cst = arith.constant 0.000000e+00 : f32
    %3 = vector.broadcast %cst : f32 to vector<8x256xf32>
    %c0_2 = arith.constant 0 : index
    %c0_3 = arith.constant 0 : index
    %c0_4 = arith.constant 0 : index
    %4 = vector.load %arg2[%c0_2, %c0_3, %c0_4] : memref<9x8x4xbf16, #tpu.memory_space<vmem>>, vector<1x8x4xbf16>
    %5 = vector.shape_cast %4 : vector<1x8x4xbf16> to vector<8x4xbf16>
    %cst_5 = arith.constant dense<0.000000e+00> : vector<8x256xf32>
    %6 = tpu.matmul %5, %2, %cst_5 {dimension_numbers = #tpu.dot_dimension_numbers<[1], [0], [0], [1], [0, 0, 1, 1], [], []>} : vector<8x4xbf16>, vector<4x256xbf16>, vector<8x256xf32> -> vector<8x256xf32>
    %7 = arith.addf %3, %6 : vector<8x256xf32>
    %c1 = arith.constant 1 : index
    %c0_6 = arith.constant 0 : index
    %c0_7 = arith.constant 0 : index
    %8 = vector.load %arg2[%c1, %c0_6, %c0_7] : memref<9x8x4xbf16, #tpu.memory_space<vmem>>, vector<1x8x4xbf16>
    %9 = vector.shape_cast %8 : vector<1x8x4xbf16> to vector<8x4xbf16>
    %cst_8 = arith.constant dense<0.000000e+00> : vector<8x256xf32>
    %10 = tpu.matmul %9, %2, %cst_8 {dimension_numbers = #tpu.dot_dimension_numbers<[1], [0], [0], [1], [0, 0, 1, 1], [], []>} : vector<8x4xbf16>, vector<4x256xbf16>, vector<8x256xf32> -> vector<8x256xf32>
    %c255_i32 = arith.constant 255 : i32
    %11 = tpu.dynamic_rotate %10 by %c255_i32 dim 1 : vector<8x256xf32>, i32 -> vector<8x256xf32>
    %12 = arith.addf %7, %11 : vector<8x256xf32>
    %c2 = arith.constant 2 : index
    %c0_9 = arith.constant 0 : index
    %c0_10 = arith.constant 0 : index
    %13 = vector.load %arg2[%c2, %c0_9, %c0_10] : memref<9x8x4xbf16, #tpu.memory_space<vmem>>, vector<1x8x4xbf16>
    %14 = vector.shape_cast %13 : vector<1x8x4xbf16> to vector<8x4xbf16>
    %cst_11 = arith.constant dense<0.000000e+00> : vector<8x256xf32>
    %15 = tpu.matmul %14, %2, %cst_11 {dimension_numbers = #tpu.dot_dimension_numbers<[1], [0], [0], [1], [0, 0, 1, 1], [], []>} : vector<8x4xbf16>, vector<4x256xbf16>, vector<8x256xf32> -> vector<8x256xf32>
    %c254_i32 = arith.constant 254 : i32
    %16 = tpu.dynamic_rotate %15 by %c254_i32 dim 1 : vector<8x256xf32>, i32 -> vector<8x256xf32>
    %17 = arith.addf %12, %16 : vector<8x256xf32>
    %c3 = arith.constant 3 : index
    %c0_12 = arith.constant 0 : index
    %c0_13 = arith.constant 0 : index
    %18 = vector.load %arg2[%c3, %c0_12, %c0_13] : memref<9x8x4xbf16, #tpu.memory_space<vmem>>, vector<1x8x4xbf16>
    %19 = vector.shape_cast %18 : vector<1x8x4xbf16> to vector<8x4xbf16>
    %cst_14 = arith.constant dense<0.000000e+00> : vector<8x256xf32>
    %20 = tpu.matmul %19, %2, %cst_14 {dimension_numbers = #tpu.dot_dimension_numbers<[1], [0], [0], [1], [0, 0, 1, 1], [], []>} : vector<8x4xbf16>, vector<4x256xbf16>, vector<8x256xf32> -> vector<8x256xf32>
    %c240_i32 = arith.constant 240 : i32
    %21 = tpu.dynamic_rotate %20 by %c240_i32 dim 1 : vector<8x256xf32>, i32 -> vector<8x256xf32>
    %22 = arith.addf %17, %21 : vector<8x256xf32>
    %c4 = arith.constant 4 : index
    %c0_15 = arith.constant 0 : index
    %c0_16 = arith.constant 0 : index
    %23 = vector.load %arg2[%c4, %c0_15, %c0_16] : memref<9x8x4xbf16, #tpu.memory_space<vmem>>, vector<1x8x4xbf16>
    %24 = vector.shape_cast %23 : vector<1x8x4xbf16> to vector<8x4xbf16>
    %cst_17 = arith.constant dense<0.000000e+00> : vector<8x256xf32>
    %25 = tpu.matmul %24, %2, %cst_17 {dimension_numbers = #tpu.dot_dimension_numbers<[1], [0], [0], [1], [0, 0, 1, 1], [], []>} : vector<8x4xbf16>, vector<4x256xbf16>, vector<8x256xf32> -> vector<8x256xf32>
    %c239_i32 = arith.constant 239 : i32
    %26 = tpu.dynamic_rotate %25 by %c239_i32 dim 1 : vector<8x256xf32>, i32 -> vector<8x256xf32>
    %27 = arith.addf %22, %26 : vector<8x256xf32>
    %c5 = arith.constant 5 : index
    %c0_18 = arith.constant 0 : index
    %c0_19 = arith.constant 0 : index
    %28 = vector.load %arg2[%c5, %c0_18, %c0_19] : memref<9x8x4xbf16, #tpu.memory_space<vmem>>, vector<1x8x4xbf16>
    %29 = vector.shape_cast %28 : vector<1x8x4xbf16> to vector<8x4xbf16>
    %cst_20 = arith.constant dense<0.000000e+00> : vector<8x256xf32>
    %30 = tpu.matmul %29, %2, %cst_20 {dimension_numbers = #tpu.dot_dimension_numbers<[1], [0], [0], [1], [0, 0, 1, 1], [], []>} : vector<8x4xbf16>, vector<4x256xbf16>, vector<8x256xf32> -> vector<8x256xf32>
    %c238_i32 = arith.constant 238 : i32
    %31 = tpu.dynamic_rotate %30 by %c238_i32 dim 1 : vector<8x256xf32>, i32 -> vector<8x256xf32>
    %32 = arith.addf %27, %31 : vector<8x256xf32>
    %c6 = arith.constant 6 : index
    %c0_21 = arith.constant 0 : index
    %c0_22 = arith.constant 0 : index
    %33 = vector.load %arg2[%c6, %c0_21, %c0_22] : memref<9x8x4xbf16, #tpu.memory_space<vmem>>, vector<1x8x4xbf16>
    %34 = vector.shape_cast %33 : vector<1x8x4xbf16> to vector<8x4xbf16>
    %cst_23 = arith.constant dense<0.000000e+00> : vector<8x256xf32>
    %35 = tpu.matmul %34, %2, %cst_23 {dimension_numbers = #tpu.dot_dimension_numbers<[1], [0], [0], [1], [0, 0, 1, 1], [], []>} : vector<8x4xbf16>, vector<4x256xbf16>, vector<8x256xf32> -> vector<8x256xf32>
    %c224_i32 = arith.constant 224 : i32
    %36 = tpu.dynamic_rotate %35 by %c224_i32 dim 1 : vector<8x256xf32>, i32 -> vector<8x256xf32>
    %37 = arith.addf %32, %36 : vector<8x256xf32>
    %c7 = arith.constant 7 : index
    %c0_24 = arith.constant 0 : index
    %c0_25 = arith.constant 0 : index
    %38 = vector.load %arg2[%c7, %c0_24, %c0_25] : memref<9x8x4xbf16, #tpu.memory_space<vmem>>, vector<1x8x4xbf16>
    %39 = vector.shape_cast %38 : vector<1x8x4xbf16> to vector<8x4xbf16>
    %cst_26 = arith.constant dense<0.000000e+00> : vector<8x256xf32>
    %40 = tpu.matmul %39, %2, %cst_26 {dimension_numbers = #tpu.dot_dimension_numbers<[1], [0], [0], [1], [0, 0, 1, 1], [], []>} : vector<8x4xbf16>, vector<4x256xbf16>, vector<8x256xf32> -> vector<8x256xf32>
    %c223_i32 = arith.constant 223 : i32
    %41 = tpu.dynamic_rotate %40 by %c223_i32 dim 1 : vector<8x256xf32>, i32 -> vector<8x256xf32>
    %42 = arith.addf %37, %41 : vector<8x256xf32>
    %c8 = arith.constant 8 : index
    %c0_27 = arith.constant 0 : index
    %c0_28 = arith.constant 0 : index
    %43 = vector.load %arg2[%c8, %c0_27, %c0_28] : memref<9x8x4xbf16, #tpu.memory_space<vmem>>, vector<1x8x4xbf16>
    %44 = vector.shape_cast %43 : vector<1x8x4xbf16> to vector<8x4xbf16>
    %cst_29 = arith.constant dense<0.000000e+00> : vector<8x256xf32>
    %45 = tpu.matmul %44, %2, %cst_29 {dimension_numbers = #tpu.dot_dimension_numbers<[1], [0], [0], [1], [0, 0, 1, 1], [], []>} : vector<8x4xbf16>, vector<4x256xbf16>, vector<8x256xf32> -> vector<8x256xf32>
    %c222_i32 = arith.constant 222 : i32
    %46 = tpu.dynamic_rotate %45 by %c222_i32 dim 1 : vector<8x256xf32>, i32 -> vector<8x256xf32>
    %47 = arith.addf %42, %46 : vector<8x256xf32>
    %cst_30 = arith.constant 0.000000e+00 : f32
    %48 = vector.broadcast %cst_30 : f32 to vector<8x256xf32>
    %49 = arith.maximumf %47, %48 : vector<8x256xf32>
    %cst_31 = arith.constant 1.200000e+01 : f32
    %50 = vector.broadcast %cst_31 : f32 to vector<8x256xf32>
    %51 = arith.mulf %49, %50 : vector<8x256xf32>
    %c0_32 = arith.constant 0 : index
    %c0_33 = arith.constant 0 : index
    %c0_34 = arith.constant 0 : index
    %52 = vector.load %arg3[%c0_32, %c0_33, %c0_34] : memref<1x8x256xf32, #tpu.memory_space<vmem>>, vector<1x8x256xf32>
    %53 = vector.shape_cast %52 : vector<1x8x256xf32> to vector<8x256xf32>
    %54 = vector.shape_cast %51 : vector<8x256xf32> to vector<1x8x256xf32>
    tpu.vector_store %arg3[%c0_32, %c0_33, %c0_34], %54 {strides = array<i32>} : memref<1x8x256xf32, #tpu.memory_space<vmem>>, vector<1x8x256xf32>,
    return
  }
  func.func @transform_0(%arg0: i32) -> (i32, i32, i32) {
    %c0_i32 = arith.constant 0 : i32
    %c0_i32_0 = arith.constant 0 : i32
    %c0_i32_1 = arith.constant 0 : i32
    return %arg0, %c0_i32, %c0_i32_0 : i32, i32, i32
  }
  func.func @transform_1(%arg0: i32) -> (i32, i32, i32) {
    %c0_i32 = arith.constant 0 : i32
    %c0_i32_0 = arith.constant 0 : i32
    %c0_i32_1 = arith.constant 0 : i32
    %c0_i32_2 = arith.constant 0 : i32
    return %c0_i32, %c0_i32_0, %c0_i32_1 : i32, i32, i32
  }
  func.func @transform_2(%arg0: i32) -> (i32, i32, i32) {
    %c0_i32 = arith.constant 0 : i32
    %c0_i32_0 = arith.constant 0 : i32
    %c0_i32_1 = arith.constant 0 : i32
    return %arg0, %c0_i32, %c0_i32_0 : i32, i32, i32
  }
}

</mosaic_0001>

<bundles_post_ra>
// kernel: tpu_custom_call.1
= control target key start
LH: loop header
LB: loop body
LE: loop exit
PB: predicated region body
PF: predicated region fallthrough
CT: control target
= control target key end

     0   :  { %7 = vsyncpa [#allocation3], 0  ;;  %s906_s0 = inlined_call_operand.vmem [shape: f32[2,4,256], index: 0, kind: input, shape index: {}]   ;;  %s907_s1 = inlined_call_operand.vmem [shape: bf16[9,8,4], index: 1, kind: input, shape index: {}]   ;;  %s908_s2 = inlined_call_operand.hbm [shape: f32[2,8,256], index: 2, kind: output, shape index: {}]  }
   0x1   :  { %9 = vsyncpa [#allocation3 + $0x1], 0  ;;  %s766_s9 = smov 0   ;;  %s768_s10 = smov 0  }
   0x2   :  { %s770_s11 = smov 0   ;;  %s772_s12 = smov 0  }
   0x3 LB: > { %s787_s13 = sadd.s32 4294967295, %s741_s12   ;;  %s592_s14 = sadd.s32 4294967294, %s741_s12   ;;  %s741_s12 = sphi %s772_s12, %s914_s12   ;;  %s737_s11 = sphi %s770_s11, %s913_s11   ;;  %s733_s10 = sphi %s768_s10, %s912_s10   ;;  %s729_s9 = sphi %s766_s9, %s911_s9  }
   0x4   : > { %s791_s15 = sadd.s32 1, %s741_s12   ;;  %s69_s16 = sadd.s32 1, %s737_s11 }
   0x5   : > { %s66_s17 = ssub.s32 %s741_s12, %s791_s15  ;;  %p79_p0 = scmp.ne.s32.totalorder %s737_s11, %s733_s10 }
   0x6   : > { %p67_p1 = scmp.eq.s32.totalorder %s66_s17, 0  ;;  %p80_p2 = scmp.eq.s32.totalorder %s787_s13, 1 }
   0x7   : > { %p85_p3 = scmp.ne.s32.totalorder %s733_s10, %s729_s9  ;;  %p86_p4 = scmp.eq.s32.totalorder %s592_s14, 1 }
   0x8   : > { %s802_s18 = scalar_select %p67_p1, %s737_s11, %s69_s16  }
   0x9   : > { %p804_p5 = por %p80_p2, %p79_p0  ;;  %p808_p6 = por %p86_p4, %p85_p3 }
   0xa   : > { %p595_p7 = scmp.ge.s32.totalorder %s741_s12, 1  ;;  %p115_p8 = scmp.lt.s32.totalorder %s741_s12, 3 }
   0xc   : > { %p116_p9 = pnand %p595_p7, %p115_p8 }
   0xd   : > { %p137_p10 = scmp.lt.s32.totalorder (!%p116_p9), %s787_s13, 1  ;;  %s744_s26 = smov (!%p116_p9), 126  }
   0xe   : > { %119 = sbr.rel (%p116_p9) target bundleno = 355 (0x163), region = 28  ;;  %s745_s27 = smov (!%p116_p9), 112  }
   0xf   : > { %s746_s28 = smov (!%p116_p9), 111   ;;  %s747_s29 = smov (!%p116_p9), 110  }
  0x10   : > { %s748_s30 = smov (!%p116_p9), 96   ;;  %s749_s3 = smov (!%p116_p9), 95  }
  0x11   : > { %s750_s4 = smov (!%p116_p9), 94   ;;  %s134_s5 = sand.u32 (!%p116_p9), 1, %s733_s10  }
  0x12   : > { %s596_s6 = sshll.u32 (!%p116_p9), %s134_s5, 4  ;;  %s631_s7 = sshll.u32 (!%p116_p9), %s787_s13, 4 }
  0x13   : > { %s138_s21 = scalar_select %p137_p10, %s787_s13, 1  ;;  %vm159_vm0 = vcmask 1041408   ;;  %v599_v7 = vld [vmem:[%s907_s1 + $0x4] sm:$0xf]  ;;  %vm155_vm1 = vcmask 31744   ;;  %v196_v59 = vlaneseq }
  0x14   : > { %v152_v8 = vld [vmem:[%s907_s1] sm:$0xf]  ;;  %v604_v9 = vld [vmem:[%s907_s1 + $0x8] sm:$0xf]  ;;  %v607_v10 = vld [vmem:[%s907_s1 + $0xc] sm:$0xf]  ;;  %s528_s16 = scalar_lea.hbm %s908_s2, %s631_s7 }
  0x15   : > { %s630_s22 = sshll.u32 %s138_s21, 3  ;;  %v610_v11 = vld [vmem:[%s907_s1 + $0x10] sm:$0xf]  ;;  %v613_v12 = vld [vmem:[%s907_s1 + $0x14] sm:$0xf]  ;;  %v197_v61 = vand.u32 127, %v196_v59 }
  0x16   : > { %s141_s25 = scalar_lea.vmem %s906_s0, %s630_s22  ;;  %v616_v13 = vld [vmem:[%s907_s1 + $0x18] sm:$0xf]  ;;  %v619_v14 = vld [vmem:[%s907_s1 + $0x1c] sm:$0xf]  ;;  %v622_v15 = vld [vmem:[%s907_s1 + $0x20] sm:$0xf] }
  0x17   : > { %v143_v0 = vld [vmem:[%s141_s25] sm:$0xff]  ;;  %s743_s25 = smov 127   ;;  %vm198_vm2 = vcmp.lt.s32.totalorder %v197_v61, 127  ;;  %vm265_vm3 = vcmp.lt.s32.totalorder %v197_v61, 126  ;;  %vm305_vm4 = vcmp.lt.s32.totalorder %v197_v61, 112  ;;  %vm345_vm5 = vcmp.lt.s32.totalorder %v197_v61, 111 }
  0x18   : > { %145 = vst [vmem:[#allocation1] ss:$2 sm:$0xff] %v143_v0  ;;  %vm385_vm6 = vcmp.lt.s32.totalorder %v197_v61, 110  ;;  %vm425_vm7 = vcmp.lt.s32.totalorder %v197_v61, 96  ;;  %vm465_vm8 = vcmp.lt.s32.totalorder %v197_v61, 95  ;;  %vm505_vm9 = vcmp.lt.s32.totalorder %v197_v61, 94 }
  0x19   : > { %s136_s17 = scalar_lea.vmem [#allocation2], %s596_s6  ;;  %s532_s22 = sshll.u32 %s528_s16, 4  ;;  %s533_s22 = int_to_ptr.hbm [resolvable:$true] %s532_s22 }
  0x1a   : > { %s530_s21 = sshll.u32 %s136_s17, 4  ;;  %s517_s13 = scalar_lea.sflag [#allocation3], %s134_s5  ;;  %s531_s21 = int_to_ptr.vmem [resolvable:$true] %s530_s21 }
  0x1b   : > { %s693_s23 = sshra.s32 %s533_s22, 4  ;;  %s694_s23 = int_to_ptr.hbm [resolvable:$true] %s693_s23 }
  0x1c   : > { %s695_s24 = scalar_lea.hbm %s694_s23, 16  ;;  %p700_p0 = scmp.lt.s32.totalorder %s694_s23, %s908_s2 }
  0x1d   : > { %p696_p11 = scmp.ne.s32.totalorder %s694_s23, %s695_s24 }
  0x1f   : > { %v146_v1 = vld.sshfl [vmem:[#allocation1] sm:$0xff pattern:$0x75316420]  ;;  %v147_v2 = vld.sshfl [vmem:[#allocation1 + $0x8] sm:$0xff pattern:$0x75316420]  ;;  %p697_p12 = pnand %p696_p11, %p804_p5 }
  0x20   : > { %v150_v3 = vpack.c.bf16 %v146_v1, %v146_v1  ;;  %v151_v4 = vpack.c.bf16 %v147_v2, %v147_v2 }
  0x21   : > { %p698_p13 = pneg %p697_p12 }
  0x22   : > { %v161_v5 = vsel %vm159_vm0, %v150_v3, 0  ;;  %v164_v6 = vsel %vm159_vm0, %v151_v4, 0 }
  0x23   : > { %173 = vmatpush.bf16.msra.mxu0 %v161_v5  ;;  %186 = vmatpush.bf16.msra.mxu1 %v164_v6 }
  0x24   : > { %211 = vmatpush.bf16.msra.mxu2 %v161_v5  ;;  %224 = vmatpush.bf16.msra.mxu3 %v164_v6 }
  0x26   : > { %600 = vmatmul.msk.bf16.vlgmr.msra.gmra.mxu0 %vm155_vm1, %v599_v7  ;;  %601 = vmatmul.msk.bf16.vlgmr.msra.gmra.mxu1 %vm155_vm1, %v599_v7 }
  0x27   : > { %255 = vmatpush.bf16.msrb.mxu1 %v164_v6  ;;  %602 = vmatmul.msk.bf16.vlgmr.msra.gmra.mxu2 %vm155_vm1, %v152_v8 }
  0x28   : > { %282 = vmatpush.bf16.msrb.mxu2 %v161_v5  ;;  %603 = vmatmul.msk.bf16.vlgmr.msra.gmra.mxu3 %vm155_vm1, %v152_v8 }
  0x29   : > { %242 = vmatpush.bf16.msrb.mxu0 %v161_v5  ;;  %295 = vmatpush.bf16.msrb.mxu3 %v164_v6 }
  0x2b   : > { %335 = vmatpush.bf16.msra.mxu1 %v164_v6 }
  0x2c   : > { %362 = vmatpush.bf16.msra.mxu2 %v161_v5 }
  0x2d   : > { %322 = vmatpush.bf16.msra.mxu0 %v161_v5  ;;  %375 = vmatpush.bf16.msra.mxu3 %v164_v6 }
  0x36   : > { %605 = vmatmul.msk.bf16.vlgmr.msrb.gmra.mxu0 %vm155_vm1, %v604_v9  ;;  %606 = vmatmul.msk.bf16.vlgmr.msrb.gmra.mxu1 %vm155_vm1, %v604_v9 }
  0x37   : > { %608 = vmatmul.msk.bf16.vlgmr.msrb.gmra.mxu2 %vm155_vm1, %v607_v10  ;;  %415 = vmatpush.bf16.msrb.mxu1 %v164_v6 }
  0x38   : > { %609 = vmatmul.msk.bf16.vlgmr.msrb.gmra.mxu3 %vm155_vm1, %v607_v10  ;;  %442 = vmatpush.bf16.msrb.mxu2 %v161_v5 }
  0x39   : > { %402 = vmatpush.bf16.msrb.mxu0 %v161_v5  ;;  %455 = vmatpush.bf16.msrb.mxu3 %v164_v6 }
  0x46   : > { %611 = vmatmul.msk.bf16.vlgmr.msra.gmra.mxu0 %vm155_vm1, %v610_v11  ;;  %612 = vmatmul.msk.bf16.vlgmr.msra.gmra.mxu1 %vm155_vm1, %v610_v11 }
  0x47   : > { %614 = vmatmul.msk.bf16.vlgmr.msra.gmra.mxu2 %vm155_vm1, %v613_v12  ;;  %495 = vmatpush.bf16.msra.mxu1 %v164_v6 }
  0x48   : > { %615 = vmatmul.msk.bf16.vlgmr.msra.gmra.mxu3 %vm155_vm1, %v613_v12  ;;  %482 = vmatpush.bf16.msra.mxu0 %v161_v5 }
  0x56   : > { %617 = vmatmul.msk.bf16.vlgmr.msrb.gmra.mxu0 %vm155_vm1, %v616_v13  ;;  %618 = vmatmul.msk.bf16.vlgmr.msrb.gmra.mxu1 %vm155_vm1, %v616_v13 }
  0x57   : > { %620 = vmatmul.msk.bf16.vlgmr.msrb.gmra.mxu2 %vm155_vm1, %v619_v14 }
  0x58   : > { %621 = vmatmul.msk.bf16.vlgmr.msrb.gmra.mxu3 %vm155_vm1, %v619_v14 }
  0x66   : > { %624 = vmatmul.msk.bf16.vlgmr.msra.gmra.mxu1 %vm155_vm1, %v622_v15  ;;  %623 = vmatmul.msk.bf16.vlgmr.msra.gmra.mxu0 %vm155_vm1, %v622_v15 }
  0xa3   : > { %v175_v16 = vpop.f32.mrf.mxu0  ;;  %v188_v17 = vpop.f32.mrf.mxu1 }
  0xa4   : > { %192 = vrot.lane.b32.xlu0 %v175_v16, %s743_s25 }
  0xaa   : > { %v864_v18 = vpop.f32.mrf.mxu2 }
  0xab   : > { %v866_v19 = vpop.f32.mrf.mxu3  ;;  %v177_v20 = vpop.f32.mrf.mxu0 }
  0xac   : > { %v190_v21 = vpop.f32.mrf.mxu1  ;;  %194 = vrot.lane.b32.xlu0 %v188_v17, %s743_s25 }
  0xb2   : > { %v215_v22 = vpop.f32.mrf.mxu2 }
  0xb3   : > { %v228_v23 = vpop.f32.mrf.mxu3  ;;  %v244_v24 = vpop.f32.mrf.mxu0 }
  0xb4   : > { %v257_v25 = vpop.f32.mrf.mxu1  ;;  %261 = vrot.lane.b32.xlu1 %v244_v24, %s744_s26 }
  0xba   : > { %v284_v26 = vpop.f32.mrf.mxu2 }
  0xbb   : > { %v297_v27 = vpop.f32.mrf.mxu3  ;;  %301 = vrot.lane.b32.xlu2 %v284_v26, %s745_s27  ;;  %v246_v28 = vpop.f32.mrf.mxu0 }
  0xbc   : > { %v259_v29 = vpop.f32.mrf.mxu1  ;;  %263 = vrot.lane.b32.xlu1 %v257_v25, %s744_s26 }
  0xc2   : > { %v286_v30 = vpop.f32.mrf.mxu2 }
  0xc3   : > { %v299_v31 = vpop.f32.mrf.mxu3  ;;  %303 = vrot.lane.b32.xlu2 %v297_v27, %s745_s27  ;;  %v324_v32 = vpop.f32.mrf.mxu0  ;;  %s699_s27 = scalar_lea.hbm %s908_s2, 32 }
  0xc4   : > { %v337_v33 = vpop.f32.mrf.mxu1  ;;  %341 = vrot.lane.b32.xlu0 %v324_v32, %s746_s28  ;;  %p701_p1 = scmp.lt.s32.totalorder %s699_s27, %s695_s24 }
  0xc5   : > { %343 = vrot.lane.b32.xlu1 %v337_v33, %s746_s28 }
  0xc6   : > { %p702_p2 = por %p701_p1, %p700_p0 }
  0xc8   : > { %p703_p3 = pnand %p702_p2, %p698_p13 }
  0xca   : > { %v364_v34 = vpop.f32.mrf.mxu2 }
  0xcb   : > { %v377_v35 = vpop.f32.mrf.mxu3  ;;  %v326_v36 = vpop.f32.mrf.mxu0  ;;  %381 = vrot.lane.b32.xlu2 %v364_v34, %s747_s29 }
  0xcc   : > { %v339_v37 = vpop.f32.mrf.mxu1  ;;  %383 = vrot.lane.b32.xlu0 %v377_v35, %s747_s29 }
  0xd2   : > { %v366_v38 = vpop.f32.mrf.mxu2 }
  0xd3   : > { %v379_v39 = vpop.f32.mrf.mxu3  ;;  %v404_v40 = vpop.f32.mrf.mxu0 }
  0xd4   : > { %v417_v41 = vpop.f32.mrf.mxu1  ;;  %421 = vrot.lane.b32.xlu1 %v404_v40, %s748_s30 }
  0xd5   : > { %423 = vrot.lane.b32.xlu2 %v417_v41, %s748_s30 }
  0xda   : > { %v444_v42 = vpop.f32.mrf.mxu2 }
  0xdb   : > { %v457_v43 = vpop.f32.mrf.mxu3  ;;  %v406_v44 = vpop.f32.mrf.mxu0  ;;  %461 = vrot.lane.b32.xlu0 %v444_v42, %s749_s3 }
  0xdc   : > { %v419_v45 = vpop.f32.mrf.mxu1  ;;  %463 = vrot.lane.b32.xlu1 %v457_v43, %s749_s3 }
  0xe2   : > { %v446_v46 = vpop.f32.mrf.mxu2 }
  0xe3   : > { %v459_v47 = vpop.f32.mrf.mxu3  ;;  %v484_v49 = vpop.f32.mrf.mxu0 }
  0xe4   : > { %v497_v48 = vpop.f32.mrf.mxu1  ;;  %501 = vrot.lane.b32.xlu2 %v484_v49, %s750_s4 }
  0xe5   : > { %503 = vrot.lane.b32.xlu0 %v497_v48, %s750_s4 }
  0xeb   : > { %v486_v51 = vpop.f32.mrf.mxu0 }
  0xec   : > { %v499_v50 = vpop.f32.mrf.mxu1 }
 0x115   : > { %v302_v54 = vpop.permute.xlu2 %301 }
 0x116   : > { %v193_v52 = vpop.permute.xlu0 %192 }
 0x11d   : > { %v304_v57 = vpop.permute.xlu2 %303 }
 0x11e   : > { %v195_v55 = vpop.permute.xlu0 %194  ;;  %v306_v10 = vsel %vm305_vm4, %v302_v54, %v304_v57  ;;  %v307_v11 = vsel %vm305_vm4, %v304_v57, %v302_v54 }
 0x11f   : > { %v199_v63 = vsel %vm198_vm2, %v193_v52, %v195_v55  ;;  %v200_v0 = vsel %vm198_vm2, %v195_v55, %v193_v52 }
 0x120   : > { %v214_v5 = vadd.f32 %v864_v18, %v199_v63  ;;  %v227_v6 = vadd.f32 %v866_v19, %v200_v0 }
 0x125   : > { %v382_v62 = vpop.permute.xlu2 %381 }
 0x126   : > { %v262_v53 = vpop.permute.xlu1 %261 }
 0x12e   : > { %v264_v56 = vpop.permute.xlu1 %263 }
 0x12f   : > { %v266_v3 = vsel %vm265_vm3, %v262_v53, %v264_v56  ;;  %v267_v4 = vsel %vm265_vm3, %v264_v56, %v262_v53  ;;  %v424_v9 = vpop.permute.xlu2 %423 }
 0x130   : > { %v268_v7 = vadd.f32 %v266_v3, %v214_v5  ;;  %v269_v8 = vadd.f32 %v267_v4, %v227_v6 }
 0x132   : > { %v308_v15 = vadd.f32 %v306_v10, %v268_v7  ;;  %v309_v16 = vadd.f32 %v307_v11, %v269_v8 }
 0x136   : > { %v342_v58 = vpop.permute.xlu0 %341 }
 0x137   : > { %v344_v60 = vpop.permute.xlu1 %343 }
 0x138   : > { %v346_v12 = vsel %vm345_vm5, %v342_v58, %v344_v60  ;;  %v347_v13 = vsel %vm345_vm5, %v344_v60, %v342_v58 }
 0x139   : > { %v348_v18 = vadd.f32 %v346_v12, %v308_v15  ;;  %v349_v19 = vadd.f32 %v347_v13, %v309_v16 }
 0x13e   : > { %v384_v1 = vpop.permute.xlu0 %383  ;;  %v502_v30 = vpop.permute.xlu2 %501 }
 0x13f   : > { %v386_v17 = vsel %vm385_vm6, %v382_v62, %v384_v1  ;;  %v387_v20 = vsel %vm385_vm6, %v384_v1, %v382_v62 }
 0x140   : > { %v388_v24 = vadd.f32 %v386_v17, %v348_v18  ;;  %v389_v25 = vadd.f32 %v387_v20, %v349_v19 }
 0x146   : > { %v422_v2 = vpop.permute.xlu1 %421 }
 0x147   : > { %v426_v22 = vsel %vm425_vm7, %v422_v2, %v424_v9  ;;  %v427_v23 = vsel %vm425_vm7, %v424_v9, %v422_v2 }
 0x148   : > { %v428_v28 = vadd.f32 %v426_v22, %v388_v24  ;;  %v429_v29 = vadd.f32 %v427_v23, %v389_v25 }
 0x14d   : > { %v462_v14 = vpop.permute.xlu0 %461 }
 0x14e   : > { %v464_v21 = vpop.permute.xlu1 %463 }
 0x14f   : > { %v466_v26 = vsel %vm465_vm8, %v462_v14, %v464_v21  ;;  %v467_v27 = vsel %vm465_vm8, %v464_v21, %v462_v14 }
 0x150   : > { %v468_v31 = vadd.f32 %v466_v26, %v428_v28  ;;  %v469_v32 = vadd.f32 %v467_v27, %v429_v29 }
 0x157   : > { %v504_v33 = vpop.permute.xlu0 %503 }
 0x158   : > { %v506_v34 = vsel %vm505_vm9, %v502_v30, %v504_v33  ;;  %v507_v35 = vsel %vm505_vm9, %v504_v33, %v502_v30 }
 0x159   : > { %v508_v36 = vadd.f32 %v506_v34, %v468_v31  ;;  %v509_v37 = vadd.f32 %v507_v35, %v469_v32 }
 0x15b   : > { %v510_v38 = vmax.f32 %v508_v36, 0.0  ;;  %v511_v39 = vmax.f32 %v509_v37, 0.0 }
 0x15d   : > { %v512_v40 = vmul.f32 12.0, %v510_v38  ;;  %v513_v41 = vmul.f32 12.0, %v511_v39 }
 0x15f   : > { %514 = vst [vmem:[%s136_s17] sm:$0xff] %v512_v40 }
 0x160   : > { %515 = vst [vmem:[%s136_s17 + $0x8] sm:$0xff] %v513_v41 }
 0x161   : > { %706 = shalt.err (!%p703_p3)
}
 0x162   : > { %632 = dma.vmem_to_hbm [thread:$0]  (%p804_p5), %s531_s21, 256, %s533_s22, %s517_s13  }
 0x163 PF: > { %p638_p4 = scmp.ge.s32.totalorder %s741_s12, 2  ;;  %s544_s30 = sand.u32 1, %s729_s9  }
 0x164   : > { %s545_s3 = scalar_lea.sflag [#allocation3], %s544_s30 }
 0x165   : > { %p635_p7 = pnand %p638_p4, %p808_p6 }
 0x167   : > { %p636_p8 = pneg %p635_p7 }
 0x169   : > { %724 = dma.done.wait (%p636_p8), %s545_s3, 256  }
 0x16a   : > { %726 = vsyncadd (%p636_p8), %s545_s3, 4294967040  ;;  %p12_p9 = scmp.ge.s32.totalorder %s791_s15, 4   ;;  %s911_s9 = smov %s733_s10 }
 0x16b   : > { %s912_s10 = smov %s737_s11  ;;  %s913_s11 = smov %s802_s18 }
 0x16c   : > { %s914_s12 = smov %s791_s15  ;;  %14 = sbr.rel (!%p12_p9) target bundleno = 3 (0x3), region = 71 }
 0x171   :  { %551 = vsyncpa [#allocation3], 1 }
 0x172   :  { %553 = vsyncpa [#allocation3 + $0x1], 1 }

</bundles_post_ra>
